<compile_context>
chip_gen: v6e
topology: v6e:2x2x1
jax: 0.10.0
libtpu: 0.0.40
codegen_flags: <defaults>
</compile_context>

<pallas_src>
import jax
import jax.numpy as jnp
import numpy as np
from jax import lax
from jax.experimental import pallas as pl
from jax.experimental.pallas import tpu as pltpu

BN_EPS = 1e-5


def _make_kernel(wc, l1, l2, off1):
    """wc: canvas row width (W+2); l1: conv1 extended-region length;
    l2: output-region length (H*wc); off1: flat offset of the canvas start."""
    off2 = wc + 1   # canvas-local offset of the conv2 / output / residual region

    def kernel(x_ref, mask_ref, w1_ref, b1_ref, w2_ref, b2_ref, out_ref):
        xin = x_ref[...]            # (rows, LX)  flat, zero-margined input rows
        mask = mask_ref[...]        # (1, l1)     interior mask, broadcasts on rows

        # ---- depthwise conv1 (BN scale folded into taps) + bias + ReLU6 ----
        acc1 = None
        for kh in range(3):
            for kw in range(3):
                d = (kh - 1) * wc + (kw - 1)          # constant flat offset
                term = w1_ref[kh * 3 + kw] * xin[:, off1 + d: off1 + d + l1]
                acc1 = term if acc1 is None else acc1 + term
        out1 = jnp.clip(acc1 + b1_ref[...], 0.0, 6.0)
        out1 = mask * out1          # zero halo == conv2's implicit zero padding

        # ---- depthwise conv2 (BN scale folded into taps) + bias + ReLU6 ----
        acc2 = None
        for kh in range(3):
            for kw in range(3):
                d = (kh - 1) * wc + (kw - 1)
                term = w2_ref[kh * 3 + kw] * out1[:, off2 + d: off2 + d + l2]
                acc2 = term if acc2 is None else acc2 + term
        out2 = jnp.clip(acc2 + b2_ref[...], 0.0, 6.0)

        # ---- residual add + final ReLU ----
        residual = xin[:, off1 + off2: off1 + off2 + l2]
        out_ref[...] = jnp.maximum(out2 + residual, 0.0)

    return kernel


def fold_bn(gamma, beta, mean, var, eps=BN_EPS):
    # TODO(synk): eval-mode BatchNorm only (running stats folded into
    # scale/bias); training-mode batch-statistics updates are not implemented.
    scale = gamma / jnp.sqrt(var + eps)
    bias = beta - mean * scale
    return scale, bias


def prepare_params(N, C, H, W, w1_dw, bn1, w2_dw, bn2):
    """Init-time constant folding: BN scale folded into the depthwise taps,
    per-row replication of taps/bias, shared interior mask.  Call once."""
    NC = N * C
    WC = W + 2
    CANVAS = (H + 2) * WC
    L1 = CANVAS + 2

    def scaled_taps(w_dw, scale):               # (C,1,3,3) -> (9, NC, 1)
        taps = w_dw.reshape(C, 9) * scale[:, None]       # fold BN scale (exact)
        taps = jnp.broadcast_to(taps.T[:, None, :], (9, N, C))
        return taps.reshape(9, NC, 1)

    def per_row(v):                             # (C,) -> (NC, 1)
        return jnp.broadcast_to(v[None, :], (N, C)).reshape(NC, 1)

    s1, b1 = fold_bn(*bn1)
    s2, b2 = fold_bn(*bn2)

    # interior mask over the conv1 extended region (1.0 inside the image),
    # shared by every row -- NOT replicated per row.
    l = np.arange(L1)
    r, c = l // WC, l % WC
    m = (l < CANVAS) & (r >= 1) & (r <= H) & (c >= 1) & (c <= W)
    mask = jnp.asarray(m.astype(np.float32)[None, :])      # (1, L1)

    return dict(mask=mask,
                w1=scaled_taps(w1_dw, s1), b1=per_row(b1),
                w2=scaled_taps(w2_dw, s2), b2=per_row(b2))


def _pick_row_tile(nc, max_rows=1024):
    """Row tile: whole batch if small; else the largest multiple-of-8 divisor
    of nc <= max_rows (keeps grid > 1 for pipelining / megacore sharding while
    staying within a conservative per-step VMEM budget)."""
    if nc <= max_rows:
        return nc
    r = (max_rows // 8) * 8
    while r >= 8:
        if nc % r == 0:
            return r
        r -= 8
    return nc


def little_basic_block_pallas(x_nchw, params):
    """x_nchw: (N, C, H, W) f32.  params: output of prepare_params().
    Implements little_BasicBlock with stride=1, downsample=None."""
    N, C, H, W = x_nchw.shape
    NC = N * C
    WC = W + 2                       # canvas row width
    CANVAS = (H + 2) * WC            # zero-haloed canvas size
    L1 = CANVAS + 2                  # conv1/out1 extent (covers all conv2 taps)
    L2 = H * WC                      # output extent: H rows of canvas width
    LX = (H + 6) * WC                # flat padded row length (single pad below)
    OFF1 = 2 * WC                    # flat offset of the canvas start

    # ---- glue: ONE pad (the 3 extra rows top/bottom double as the flat side
    #      margins) + a contiguous (free) reshape to lane-dense flat rows -----
    xpad = jnp.pad(x_nchw, ((0, 0), (0, 0), (3, 3), (1, 1)))   # (N,C,H+6,WC)
    xin = xpad.reshape(NC, LX)

    rows = _pick_row_tile(NC)        # multiple of 8, divides NC
    # per grid step, double-buffered VMEM ~= 2*rows*(LX+L1+L2)*4 B
    # (~8 KB/row at 16x16 spatial) -> rows<=1024 stays far under v7x's
    # 32 MiB scoped-VMEM default, so the same kernel is portable to v5e/v6e.
    kernel = _make_kernel(WC, L1, L2, OFF1)

    out_flat = pl.pallas_call(
        kernel,
        out_shape=jax.ShapeDtypeStruct((NC, L2), jnp.float32),
        grid=(NC // rows,),
        in_specs=[
            pl.BlockSpec((rows, LX), lambda i: (i, 0)),       # input rows
            pl.BlockSpec((1, L1), lambda i: (0, 0)),          # shared mask
            pl.BlockSpec((9, rows, 1), lambda i: (0, i, 0)),  # conv1 taps*scale
            pl.BlockSpec((rows, 1), lambda i: (i, 0)),        # conv1 bias
            pl.BlockSpec((9, rows, 1), lambda i: (0, i, 0)),  # conv2 taps*scale
            pl.BlockSpec((rows, 1), lambda i: (i, 0)),        # conv2 bias
        ],
        out_specs=pl.BlockSpec((rows, L2), lambda i: (i, 0)),
        compiler_params=pltpu.CompilerParams(
            dimension_semantics=("parallel",)),
    )(xin, params["mask"], params["w1"], params["b1"],
      params["w2"], params["b2"])

    # lane-dense (NC, H*WC) slab -> NCHW (drop the 2 junk columns per row).
    # TODO(synk): at scale, keep the padded (N,C,H,WC) layout downstream or
    # fuse this slice into the consumer instead of materializing it here.
    return out_flat.reshape(N, C, H, WC)[:, :, :, :W]


def reference_little_basic_block(x_nchw, w1_dw, bn1, w2_dw, bn2):
    """Pure-JAX reference for little_BasicBlock (eval-mode BN)."""
    C = x_nchw.shape[1]

    def dwconv(x, w):
        return lax.conv_general_dilated(
            x, w, window_strides=(1, 1), padding=((1, 1), (1, 1)),
            dimension_numbers=("NCHW", "OIHW", "NCHW"),
            feature_group_count=C)

    def bn(x, p):
        g, b, m, v = (t.reshape(1, -1, 1, 1) for t in p)
        return (x - m) / jnp.sqrt(v + BN_EPS) * g + b

    def relu6(t):
        return jnp.clip(t, 0.0, 6.0)

    out = relu6(bn(dwconv(x_nchw, w1_dw), bn1))
    out = relu6(bn(dwconv(out, w2_dw), bn2))
    return jax.nn.relu(out + x_nchw)


if __name__ == "__main__":
    # little_BasicBlock(inplanes=4, planes=4, stride=1, downsample=None)
    N, C, H, W = 2, 4, 16, 16
    key = jax.random.PRNGKey(0)
    ks = jax.random.split(key, 11)

    x = jax.random.normal(ks[0], (N, C, H, W), jnp.float32)

    # depthwise conv weights in PyTorch layout (C, 1, 3, 3)
    w1 = jax.random.normal(ks[1], (C, 1, 3, 3), jnp.float32) * 0.3
    w2 = jax.random.normal(ks[2], (C, 1, 3, 3), jnp.float32) * 0.3

    # eval-mode BatchNorm parameters (gamma, beta, running_mean, running_var)
    bn1 = (1.0 + 0.1 * jax.random.normal(ks[3], (C,), jnp.float32),
           0.1 * jax.random.normal(ks[4], (C,), jnp.float32),
           0.1 * jax.random.normal(ks[5], (C,), jnp.float32),
           0.5 + jax.random.uniform(ks[6], (C,), jnp.float32))
    bn2 = (1.0 + 0.1 * jax.random.normal(ks[7], (C,), jnp.float32),
           0.1 * jax.random.normal(ks[8], (C,), jnp.float32),
           0.1 * jax.random.normal(ks[9], (C,), jnp.float32),
           0.5 + jax.random.uniform(ks[10], (C,), jnp.float32))

    params = prepare_params(N, C, H, W, w1, bn1, w2, bn2)   # init-time folding
    fwd = jax.jit(little_basic_block_pallas)                # fuse wrapper glue

    out = jax.block_until_ready(fwd(x, params))

    ref = reference_little_basic_block(x, w1, bn1, w2, bn2)
    np.testing.assert_allclose(np.asarray(out), np.asarray(ref),
                               rtol=1e-4, atol=1e-4)
    print("KERNEL_OK")
</pallas_src>

<mosaic_0001>
module attributes {stable_mosaic.version = 11 : i64} {
  func.func @kernel(%arg0: i32, %arg1: memref<8x396xf32, #tpu.memory_space<vmem>>, %arg2: memref<1x326xf32, #tpu.memory_space<vmem>>, %arg3: memref<9x8x1xf32, #tpu.memory_space<vmem>>, %arg4: memref<8x1xf32, #tpu.memory_space<vmem>>, %arg5: memref<9x8x1xf32, #tpu.memory_space<vmem>>, %arg6: memref<8x1xf32, #tpu.memory_space<vmem>>, %arg7: memref<8x288xf32, #tpu.memory_space<vmem>>) attributes {dimension_semantics = [#tpu.dimension_semantics<parallel>], iteration_bounds = array<i64: 1>, scalar_prefetch = 0 : i64, scratch_operands = 0 : i64, tpu.core_type = #tpu.core_type<tc>, window_params = [{transform_indices = @transform_0, window_bounds = array<i64: 8, 396>}, {pipeline_mode = #tpu.pipeline_mode<synchronous>, transform_indices = @transform_1, window_bounds = array<i64: 1, 326>}, {transform_indices = @transform_2, window_bounds = array<i64: 9, 8, 1>}, {transform_indices = @transform_3, window_bounds = array<i64: 8, 1>}, {transform_indices = @transform_4, window_bounds = array<i64: 9, 8, 1>}, {transform_indices = @transform_5, window_bounds = array<i64: 8, 1>}, {transform_indices = @transform_6, window_bounds = array<i64: 8, 288>}]} {
    %c0 = arith.constant 0 : index
    %c0_0 = arith.constant 0 : index
    %0 = vector.load %arg1[%c0, %c0_0] : memref<8x396xf32, #tpu.memory_space<vmem>>, vector<8x396xf32>
    %c0_1 = arith.constant 0 : index
    %c0_2 = arith.constant 0 : index
    %1 = vector.load %arg2[%c0_1, %c0_2] : memref<1x326xf32, #tpu.memory_space<vmem>>, vector<1x326xf32>
    %c0_3 = arith.constant 0 : index
    %c0_4 = arith.constant 0 : index
    %c0_5 = arith.constant 0 : index
    %2 = vector.load %arg3[%c0_3, %c0_4, %c0_5] : memref<9x8x1xf32, #tpu.memory_space<vmem>>, vector<1x8x1xf32>
    %3 = vector.shape_cast %2 : vector<1x8x1xf32> to vector<8x1xf32>
    %4 = vector.extract_strided_slice %0 {offsets = [0, 17], sizes = [8, 326], strides = [1, 1]} : vector<8x396xf32> to vector<8x326xf32>
    %5 = vector.broadcast %3 : vector<8x1xf32> to vector<8x326xf32>
    %6 = arith.mulf %5, %4 : vector<8x326xf32>
    %c1 = arith.constant 1 : index
    %c0_6 = arith.constant 0 : index
    %c0_7 = arith.constant 0 : index
    %7 = vector.load %arg3[%c1, %c0_6, %c0_7] : memref<9x8x1xf32, #tpu.memory_space<vmem>>, vector<1x8x1xf32>
    %8 = vector.shape_cast %7 : vector<1x8x1xf32> to vector<8x1xf32>
    %9 = vector.extract_strided_slice %0 {offsets = [0, 18], sizes = [8, 326], strides = [1, 1]} : vector<8x396xf32> to vector<8x326xf32>
    %10 = vector.broadcast %8 : vector<8x1xf32> to vector<8x326xf32>
    %11 = arith.mulf %10, %9 : vector<8x326xf32>
    %12 = arith.addf %6, %11 : vector<8x326xf32>
    %c2 = arith.constant 2 : index
    %c0_8 = arith.constant 0 : index
    %c0_9 = arith.constant 0 : index
    %13 = vector.load %arg3[%c2, %c0_8, %c0_9] : memref<9x8x1xf32, #tpu.memory_space<vmem>>, vector<1x8x1xf32>
    %14 = vector.shape_cast %13 : vector<1x8x1xf32> to vector<8x1xf32>
    %15 = vector.extract_strided_slice %0 {offsets = [0, 19], sizes = [8, 326], strides = [1, 1]} : vector<8x396xf32> to vector<8x326xf32>
    %16 = vector.broadcast %14 : vector<8x1xf32> to vector<8x326xf32>
    %17 = arith.mulf %16, %15 : vector<8x326xf32>
    %18 = arith.addf %12, %17 : vector<8x326xf32>
    %c3 = arith.constant 3 : index
    %c0_10 = arith.constant 0 : index
    %c0_11 = arith.constant 0 : index
    %19 = vector.load %arg3[%c3, %c0_10, %c0_11] : memref<9x8x1xf32, #tpu.memory_space<vmem>>, vector<1x8x1xf32>
    %20 = vector.shape_cast %19 : vector<1x8x1xf32> to vector<8x1xf32>
    %21 = vector.extract_strided_slice %0 {offsets = [0, 35], sizes = [8, 326], strides = [1, 1]} : vector<8x396xf32> to vector<8x326xf32>
    %22 = vector.broadcast %20 : vector<8x1xf32> to vector<8x326xf32>
    %23 = arith.mulf %22, %21 : vector<8x326xf32>
    %24 = arith.addf %18, %23 : vector<8x326xf32>
    %c4 = arith.constant 4 : index
    %c0_12 = arith.constant 0 : index
    %c0_13 = arith.constant 0 : index
    %25 = vector.load %arg3[%c4, %c0_12, %c0_13] : memref<9x8x1xf32, #tpu.memory_space<vmem>>, vector<1x8x1xf32>
    %26 = vector.shape_cast %25 : vector<1x8x1xf32> to vector<8x1xf32>
    %27 = vector.extract_strided_slice %0 {offsets = [0, 36], sizes = [8, 326], strides = [1, 1]} : vector<8x396xf32> to vector<8x326xf32>
    %28 = vector.broadcast %26 : vector<8x1xf32> to vector<8x326xf32>
    %29 = arith.mulf %28, %27 : vector<8x326xf32>
    %30 = arith.addf %24, %29 : vector<8x326xf32>
    %c5 = arith.constant 5 : index
    %c0_14 = arith.constant 0 : index
    %c0_15 = arith.constant 0 : index
    %31 = vector.load %arg3[%c5, %c0_14, %c0_15] : memref<9x8x1xf32, #tpu.memory_space<vmem>>, vector<1x8x1xf32>
    %32 = vector.shape_cast %31 : vector<1x8x1xf32> to vector<8x1xf32>
    %33 = vector.extract_strided_slice %0 {offsets = [0, 37], sizes = [8, 326], strides = [1, 1]} : vector<8x396xf32> to vector<8x326xf32>
    %34 = vector.broadcast %32 : vector<8x1xf32> to vector<8x326xf32>
    %35 = arith.mulf %34, %33 : vector<8x326xf32>
    %36 = arith.addf %30, %35 : vector<8x326xf32>
    %c6 = arith.constant 6 : index
    %c0_16 = arith.constant 0 : index
    %c0_17 = arith.constant 0 : index
    %37 = vector.load %arg3[%c6, %c0_16, %c0_17] : memref<9x8x1xf32, #tpu.memory_space<vmem>>, vector<1x8x1xf32>
    %38 = vector.shape_cast %37 : vector<1x8x1xf32> to vector<8x1xf32>
    %39 = vector.extract_strided_slice %0 {offsets = [0, 53], sizes = [8, 326], strides = [1, 1]} : vector<8x396xf32> to vector<8x326xf32>
    %40 = vector.broadcast %38 : vector<8x1xf32> to vector<8x326xf32>
    %41 = arith.mulf %40, %39 : vector<8x326xf32>
    %42 = arith.addf %36, %41 : vector<8x326xf32>
    %c7 = arith.constant 7 : index
    %c0_18 = arith.constant 0 : index
    %c0_19 = arith.constant 0 : index
    %43 = vector.load %arg3[%c7, %c0_18, %c0_19] : memref<9x8x1xf32, #tpu.memory_space<vmem>>, vector<1x8x1xf32>
    %44 = vector.shape_cast %43 : vector<1x8x1xf32> to vector<8x1xf32>
    %45 = vector.extract_strided_slice %0 {offsets = [0, 54], sizes = [8, 326], strides = [1, 1]} : vector<8x396xf32> to vector<8x326xf32>
    %46 = vector.broadcast %44 : vector<8x1xf32> to vector<8x326xf32>
    %47 = arith.mulf %46, %45 : vector<8x326xf32>
    %48 = arith.addf %42, %47 : vector<8x326xf32>
    %c8 = arith.constant 8 : index
    %c0_20 = arith.constant 0 : index
    %c0_21 = arith.constant 0 : index
    %49 = vector.load %arg3[%c8, %c0_20, %c0_21] : memref<9x8x1xf32, #tpu.memory_space<vmem>>, vector<1x8x1xf32>
    %50 = vector.shape_cast %49 : vector<1x8x1xf32> to vector<8x1xf32>
    %51 = vector.extract_strided_slice %0 {offsets = [0, 55], sizes = [8, 326], strides = [1, 1]} : vector<8x396xf32> to vector<8x326xf32>
    %52 = vector.broadcast %50 : vector<8x1xf32> to vector<8x326xf32>
    %53 = arith.mulf %52, %51 : vector<8x326xf32>
    %54 = arith.addf %48, %53 : vector<8x326xf32>
    %c0_22 = arith.constant 0 : index
    %c0_23 = arith.constant 0 : index
    %55 = vector.load %arg4[%c0_22, %c0_23] : memref<8x1xf32, #tpu.memory_space<vmem>>, vector<8x1xf32>
    %56 = vector.broadcast %55 : vector<8x1xf32> to vector<8x326xf32>
    %57 = arith.addf %54, %56 : vector<8x326xf32>
    %cst = arith.constant 0.000000e+00 : f32
    %cst_24 = arith.constant 6.000000e+00 : f32
    %58 = vector.broadcast %cst : f32 to vector<8x326xf32>
    %59 = arith.maximumf %58, %57 : vector<8x326xf32>
    %60 = vector.broadcast %cst_24 : f32 to vector<8x326xf32>
    %61 = arith.minimumf %60, %59 : vector<8x326xf32>
    %62 = vector.broadcast %1 : vector<1x326xf32> to vector<8x326xf32>
    %63 = arith.mulf %62, %61 : vector<8x326xf32>
    %c0_25 = arith.constant 0 : index
    %c0_26 = arith.constant 0 : index
    %c0_27 = arith.constant 0 : index
    %64 = vector.load %arg5[%c0_25, %c0_26, %c0_27] : memref<9x8x1xf32, #tpu.memory_space<vmem>>, vector<1x8x1xf32>
    %65 = vector.shape_cast %64 : vector<1x8x1xf32> to vector<8x1xf32>
    %66 = vector.extract_strided_slice %63 {offsets = [0, 0], sizes = [8, 288], strides = [1, 1]} : vector<8x326xf32> to vector<8x288xf32>
    %67 = vector.broadcast %65 : vector<8x1xf32> to vector<8x288xf32>
    %68 = arith.mulf %67, %66 : vector<8x288xf32>
    %c1_28 = arith.constant 1 : index
    %c0_29 = arith.constant 0 : index
    %c0_30 = arith.constant 0 : index
    %69 = vector.load %arg5[%c1_28, %c0_29, %c0_30] : memref<9x8x1xf32, #tpu.memory_space<vmem>>, vector<1x8x1xf32>
    %70 = vector.shape_cast %69 : vector<1x8x1xf32> to vector<8x1xf32>
    %71 = vector.extract_strided_slice %63 {offsets = [0, 1], sizes = [8, 288], strides = [1, 1]} : vector<8x326xf32> to vector<8x288xf32>
    %72 = vector.broadcast %70 : vector<8x1xf32> to vector<8x288xf32>
    %73 = arith.mulf %72, %71 : vector<8x288xf32>
    %74 = arith.addf %68, %73 : vector<8x288xf32>
    %c2_31 = arith.constant 2 : index
    %c0_32 = arith.constant 0 : index
    %c0_33 = arith.constant 0 : index
    %75 = vector.load %arg5[%c2_31, %c0_32, %c0_33] : memref<9x8x1xf32, #tpu.memory_space<vmem>>, vector<1x8x1xf32>
    %76 = vector.shape_cast %75 : vector<1x8x1xf32> to vector<8x1xf32>
    %77 = vector.extract_strided_slice %63 {offsets = [0, 2], sizes = [8, 288], strides = [1, 1]} : vector<8x326xf32> to vector<8x288xf32>
    %78 = vector.broadcast %76 : vector<8x1xf32> to vector<8x288xf32>
    %79 = arith.mulf %78, %77 : vector<8x288xf32>
    %80 = arith.addf %74, %79 : vector<8x288xf32>
    %c3_34 = arith.constant 3 : index
    %c0_35 = arith.constant 0 : index
    %c0_36 = arith.constant 0 : index
    %81 = vector.load %arg5[%c3_34, %c0_35, %c0_36] : memref<9x8x1xf32, #tpu.memory_space<vmem>>, vector<1x8x1xf32>
    %82 = vector.shape_cast %81 : vector<1x8x1xf32> to vector<8x1xf32>
    %83 = vector.extract_strided_slice %63 {offsets = [0, 18], sizes = [8, 288], strides = [1, 1]} : vector<8x326xf32> to vector<8x288xf32>
    %84 = vector.broadcast %82 : vector<8x1xf32> to vector<8x288xf32>
    %85 = arith.mulf %84, %83 : vector<8x288xf32>
    %86 = arith.addf %80, %85 : vector<8x288xf32>
    %c4_37 = arith.constant 4 : index
    %c0_38 = arith.constant 0 : index
    %c0_39 = arith.constant 0 : index
    %87 = vector.load %arg5[%c4_37, %c0_38, %c0_39] : memref<9x8x1xf32, #tpu.memory_space<vmem>>, vector<1x8x1xf32>
    %88 = vector.shape_cast %87 : vector<1x8x1xf32> to vector<8x1xf32>
    %89 = vector.extract_strided_slice %63 {offsets = [0, 19], sizes = [8, 288], strides = [1, 1]} : vector<8x326xf32> to vector<8x288xf32>
    %90 = vector.broadcast %88 : vector<8x1xf32> to vector<8x288xf32>
    %91 = arith.mulf %90, %89 : vector<8x288xf32>
    %92 = arith.addf %86, %91 : vector<8x288xf32>
    %c5_40 = arith.constant 5 : index
    %c0_41 = arith.constant 0 : index
    %c0_42 = arith.constant 0 : index
    %93 = vector.load %arg5[%c5_40, %c0_41, %c0_42] : memref<9x8x1xf32, #tpu.memory_space<vmem>>, vector<1x8x1xf32>
    %94 = vector.shape_cast %93 : vector<1x8x1xf32> to vector<8x1xf32>
    %95 = vector.extract_strided_slice %63 {offsets = [0, 20], sizes = [8, 288], strides = [1, 1]} : vector<8x326xf32> to vector<8x288xf32>
    %96 = vector.broadcast %94 : vector<8x1xf32> to vector<8x288xf32>
    %97 = arith.mulf %96, %95 : vector<8x288xf32>
    %98 = arith.addf %92, %97 : vector<8x288xf32>
    %c6_43 = arith.constant 6 : index
    %c0_44 = arith.constant 0 : index
    %c0_45 = arith.constant 0 : index
    %99 = vector.load %arg5[%c6_43, %c0_44, %c0_45] : memref<9x8x1xf32, #tpu.memory_space<vmem>>, vector<1x8x1xf32>
    %100 = vector.shape_cast %99 : vector<1x8x1xf32> to vector<8x1xf32>
    %101 = vector.extract_strided_slice %63 {offsets = [0, 36], sizes = [8, 288], strides = [1, 1]} : vector<8x326xf32> to vector<8x288xf32>
    %102 = vector.broadcast %100 : vector<8x1xf32> to vector<8x288xf32>
    %103 = arith.mulf %102, %101 : vector<8x288xf32>
    %104 = arith.addf %98, %103 : vector<8x288xf32>
    %c7_46 = arith.constant 7 : index
    %c0_47 = arith.constant 0 : index
    %c0_48 = arith.constant 0 : index
    %105 = vector.load %arg5[%c7_46, %c0_47, %c0_48] : memref<9x8x1xf32, #tpu.memory_space<vmem>>, vector<1x8x1xf32>
    %106 = vector.shape_cast %105 : vector<1x8x1xf32> to vector<8x1xf32>
    %107 = vector.extract_strided_slice %63 {offsets = [0, 37], sizes = [8, 288], strides = [1, 1]} : vector<8x326xf32> to vector<8x288xf32>
    %108 = vector.broadcast %106 : vector<8x1xf32> to vector<8x288xf32>
    %109 = arith.mulf %108, %107 : vector<8x288xf32>
    %110 = arith.addf %104, %109 : vector<8x288xf32>
    %c8_49 = arith.constant 8 : index
    %c0_50 = arith.constant 0 : index
    %c0_51 = arith.constant 0 : index
    %111 = vector.load %arg5[%c8_49, %c0_50, %c0_51] : memref<9x8x1xf32, #tpu.memory_space<vmem>>, vector<1x8x1xf32>
    %112 = vector.shape_cast %111 : vector<1x8x1xf32> to vector<8x1xf32>
    %113 = vector.extract_strided_slice %63 {offsets = [0, 38], sizes = [8, 288], strides = [1, 1]} : vector<8x326xf32> to vector<8x288xf32>
    %114 = vector.broadcast %112 : vector<8x1xf32> to vector<8x288xf32>
    %115 = arith.mulf %114, %113 : vector<8x288xf32>
    %116 = arith.addf %110, %115 : vector<8x288xf32>
    %c0_52 = arith.constant 0 : index
    %c0_53 = arith.constant 0 : index
    %117 = vector.load %arg6[%c0_52, %c0_53] : memref<8x1xf32, #tpu.memory_space<vmem>>, vector<8x1xf32>
    %118 = vector.broadcast %117 : vector<8x1xf32> to vector<8x288xf32>
    %119 = arith.addf %116, %118 : vector<8x288xf32>
    %cst_54 = arith.constant 0.000000e+00 : f32
    %cst_55 = arith.constant 6.000000e+00 : f32
    %120 = vector.broadcast %cst_54 : f32 to vector<8x288xf32>
    %121 = arith.maximumf %120, %119 : vector<8x288xf32>
    %122 = vector.broadcast %cst_55 : f32 to vector<8x288xf32>
    %123 = arith.minimumf %122, %121 : vector<8x288xf32>
    %124 = vector.extract_strided_slice %0 {offsets = [0, 55], sizes = [8, 288], strides = [1, 1]} : vector<8x396xf32> to vector<8x288xf32>
    %125 = arith.addf %123, %124 : vector<8x288xf32>
    %cst_56 = arith.constant 0.000000e+00 : f32
    %126 = vector.broadcast %cst_56 : f32 to vector<8x288xf32>
    %127 = arith.maximumf %125, %126 : vector<8x288xf32>
    %c0_57 = arith.constant 0 : index
    %c0_58 = arith.constant 0 : index
    %128 = vector.load %arg7[%c0_57, %c0_58] : memref<8x288xf32, #tpu.memory_space<vmem>>, vector<8x288xf32>
    tpu.vector_store %arg7[%c0_57, %c0_58], %127 {strides = array<i32>} : memref<8x288xf32, #tpu.memory_space<vmem>>, vector<8x288xf32>,
    return
  }
  func.func @transform_0(%arg0: i32) -> (i32, i32) {
    %c0_i32 = arith.constant 0 : i32
    %c0_i32_0 = arith.constant 0 : i32
    return %arg0, %c0_i32 : i32, i32
  }
  func.func @transform_1(%arg0: i32) -> (i32, i32) {
    %c0_i32 = arith.constant 0 : i32
    %c0_i32_0 = arith.constant 0 : i32
    %c0_i32_1 = arith.constant 0 : i32
    return %c0_i32, %c0_i32_0 : i32, i32
  }
  func.func @transform_2(%arg0: i32) -> (i32, i32, i32) {
    %c0_i32 = arith.constant 0 : i32
    %c0_i32_0 = arith.constant 0 : i32
    %c0_i32_1 = arith.constant 0 : i32
    return %c0_i32, %arg0, %c0_i32_0 : i32, i32, i32
  }
  func.func @transform_3(%arg0: i32) -> (i32, i32) {
    %c0_i32 = arith.constant 0 : i32
    %c0_i32_0 = arith.constant 0 : i32
    return %arg0, %c0_i32 : i32, i32
  }
  func.func @transform_4(%arg0: i32) -> (i32, i32, i32) {
    %c0_i32 = arith.constant 0 : i32
    %c0_i32_0 = arith.constant 0 : i32
    %c0_i32_1 = arith.constant 0 : i32
    return %c0_i32, %arg0, %c0_i32_0 : i32, i32, i32
  }
  func.func @transform_5(%arg0: i32) -> (i32, i32) {
    %c0_i32 = arith.constant 0 : i32
    %c0_i32_0 = arith.constant 0 : i32
    return %arg0, %c0_i32 : i32, i32
  }
  func.func @transform_6(%arg0: i32) -> (i32, i32) {
    %c0_i32 = arith.constant 0 : i32
    %c0_i32_0 = arith.constant 0 : i32
    return %arg0, %c0_i32 : i32, i32
  }
}

</mosaic_0001>

<bundles_post_ra>
// kernel: little_basic_block_pallas.1
= control target key start
LH: loop header
LB: loop body
LE: loop exit
PB: predicated region body
PF: predicated region fallthrough
CT: control target
= control target key end

     0   :  { %v607_v0 = vmov 0   ;;  %s609_s22 = smov 126   ;;  %s611_s23 = smov 109   ;;  %vm55_vm0 = vcmask 1039360   ;;  %vm83_vm1 = vcmask 1031168   ;;  %vm111_vm2 = vcmask 900096   ;;  %s893_s2 = inlined_call_operand.vmem [shape: f32[9,8,1], index: 2, kind: input, shape index: {}]   ;;  %s894_s3 = inlined_call_operand.vmem [shape: f32[8,1], index: 3, kind: input, shape index: {}]   ;;  %s895_s0 = inlined_call_operand.vmem [shape: f32[8,396], index: 0, kind: input, shape index: {}]   ;;  %s896_s4 = inlined_call_operand.vmem [shape: f32[9,8,1], index: 4, kind: input, shape index: {}]   ;;  %s897_s5 = inlined_call_operand.vmem [shape: f32[8,1], index: 5, kind: input, shape index: {}]   ;;  %s898_s1 = inlined_call_operand.vmem [shape: f32[1,326], index: 1, kind: input, shape index: {}]   ;;  %s899_s6 = inlined_call_operand.vmem [shape: f32[8,288], index: 6, kind: output, shape index: {}]  }
   0x1   :  { %606 = vset.pattern.permute.xlu1 %v607_v0  ;;  %605 = vset.pattern.permute.xlu0 %v607_v0  ;;  %v580_v1 = vld [vmem:[%s893_s2 + $0x18] sm:$0xff]  ;;  %v578_v2 = vld [vmem:[%s893_s2 + $0x8] sm:$0xff]  ;;  %v581_v3 = vld [vmem:[%s893_s2 + $0x20] sm:$0xff]  ;;  %s612_s24 = smov 108   ;;  %s613_s25 = smov 92   ;;  %vm139_vm3 = vcmask 891904  }
   0x2   :  { %96 = vperm.xlu1 %606, %v580_v1   ;;  %40 = vperm.xlu0 %605, %v578_v2   ;;  %v579_v4 = vld [vmem:[%s893_s2 + $0x10] sm:$0xff]  ;;  %v582_v6 = vld [vmem:[%s893_s2 + $0x28] sm:$0xff]  ;;  %v585_v7 = vld [vmem:[%s893_s2 + $0x40] sm:$0xff]  ;;  %s614_s26 = smov 91   ;;  %s615_s27 = smov 90   ;;  %vm167_vm4 = vcmask 883712  }
   0x3   :  { %v583_v5 = vld [vmem:[%s893_s2 + $0x30] sm:$0xff]  ;;  %v584_v8 = vld [vmem:[%s893_s2 + $0x38] sm:$0xff]  ;;  %v27_v9 = vld [vmem:[%s893_s2] sm:$0xff]  ;;  %vm195_vm5 = vcmask 752640   ;;  %vm223_vm6 = vcmask 744448   ;;  %vm251_vm7 = vcmask 736256  }
   0x4   :  { %v260_v10 = vld [vmem:[%s894_s3] sm:$0xff]  ;;  %v691_v12 = vld [vmem:[%s895_s0 + $0x8] sm:$0xff]  ;;  %v697_v15 = vld [vmem:[%s895_s0 + $0x10] sm:$0xff]  ;;  %s608_s3 = smov 127   ;;  %s616_s8 = smov 111   ;;  %vm300_vm8 = vcmask 908288  }
   0x5   :  { %v686_v11 = vld [vmem:[%s895_s0] sm:$0xff]  ;;  %s610_s0 = smov 110   ;;  %v586_v45 = vld [vmem:[%s896_s4 + $0x8] sm:$0xff]  ;;  %v587_v47 = vld [vmem:[%s896_s4 + $0x10] sm:$0xff]  ;;  %vm558_vm9 = vcmask 596992   ;;  %vm572_vm10 = vcmask 261120  }
   0x6   :  { %124 = vperm.xlu1 %606, %v581_v3   ;;  %68 = vperm.xlu0 %605, %v579_v4  }
   0xa   :  { %180 = vperm.xlu1 %606, %v583_v5   ;;  %152 = vperm.xlu0 %605, %v582_v6  }
   0xe   :  { %236 = vperm.xlu1 %606, %v585_v7   ;;  %208 = vperm.xlu0 %605, %v584_v8  }
  0x12   :  { %30 = vperm.xlu0 %605, %v27_v9  }
  0x16   :  { %263 = vperm.xlu0 %605, %v260_v10  }
  0x7d   :  { %v41_v13 = vpop.permute.xlu0 %40  ;;  %v97_v21 = vpop.permute.xlu1 %96 }
  0x7e   :  { %v43_v14 = vmul.f32 %v41_v13, %v686_v11  ;;  %v44_v16 = vmul.f32 %v41_v13, %v691_v12  ;;  %v45_v18 = vmul.f32 %v41_v13, %v697_v15  ;;  %v99_v23 = vmul.f32 %v97_v21, %v686_v11 }
  0x7f   :  { %v100_v24 = vmul.f32 %v97_v21, %v691_v12  ;;  %v101_v25 = vmul.f32 %v97_v21, %v697_v15 }
  0x80   :  { %49 = vrot.lane.b32.xlu1 %v43_v14, %s608_s3  ;;  %51 = vrot.lane.b32.xlu0 %v44_v16, %s608_s3 }
  0x81   :  { %v69_v17 = vpop.permute.xlu0 %68  ;;  %v125_v26 = vpop.permute.xlu1 %124 }
  0x82   :  { %v71_v19 = vmul.f32 %v69_v17, %v686_v11  ;;  %v72_v20 = vmul.f32 %v69_v17, %v691_v12  ;;  %v73_v22 = vmul.f32 %v69_v17, %v697_v15  ;;  %v127_v27 = vmul.f32 %v125_v26, %v686_v11 }
  0x83   :  { %v128_v28 = vmul.f32 %v125_v26, %v691_v12  ;;  %v129_v29 = vmul.f32 %v125_v26, %v697_v15 }
  0x84   :  { %53 = vrot.lane.b32.xlu1 %v45_v18, %s608_s3  ;;  %77 = vrot.lane.b32.xlu0 %v71_v19, %s609_s22 }
  0x85   :  { %v153_v30 = vpop.permute.xlu0 %152  ;;  %v181_v33 = vpop.permute.xlu1 %180 }
  0x86   :  { %v155_v31 = vmul.f32 %v153_v30, %v686_v11  ;;  %v156_v32 = vmul.f32 %v153_v30, %v691_v12  ;;  %v157_v34 = vmul.f32 %v153_v30, %v697_v15  ;;  %v183_v35 = vmul.f32 %v181_v33, %v686_v11 }
  0x87   :  { %v184_v36 = vmul.f32 %v181_v33, %v691_v12  ;;  %v185_v37 = vmul.f32 %v181_v33, %v697_v15 }
  0x88   :  { %79 = vrot.lane.b32.xlu1 %v72_v20, %s609_s22  ;;  %81 = vrot.lane.b32.xlu0 %v73_v22, %s609_s22 }
  0x89   :  { %v209_v38 = vpop.permute.xlu0 %208  ;;  %v237_v41 = vpop.permute.xlu1 %236 }
  0x8a   :  { %v211_v39 = vmul.f32 %v209_v38, %v686_v11  ;;  %v212_v40 = vmul.f32 %v209_v38, %v691_v12  ;;  %v213_v42 = vmul.f32 %v209_v38, %v697_v15  ;;  %v240_v43 = vmul.f32 %v237_v41, %v691_v12 }
  0x8b   :  { %v239_v44 = vmul.f32 %v237_v41, %v686_v11  ;;  %v241_v46 = vmul.f32 %v237_v41, %v697_v15 }
  0x8c   :  { %105 = vrot.lane.b32.xlu1 %v99_v23, %s610_s0  ;;  %107 = vrot.lane.b32.xlu0 %v100_v24, %s610_s0 }
  0x8d   :  { %v31_v48 = vpop.permute.xlu0 %30 }
  0x8e   :  { %v33_v3 = vmul.f32 %v31_v48, %v686_v11  ;;  %v35_v6 = vmul.f32 %v31_v48, %v697_v15  ;;  %v34_v10 = vmul.f32 %v31_v48, %v691_v12 }
  0x90   :  { %109 = vrot.lane.b32.xlu1 %v101_v25, %s610_s0  ;;  %133 = vrot.lane.b32.xlu0 %v127_v27, %s611_s23 }
  0x91   :  { %v752_v49 = vpop.permute.xlu0 %263 }
  0x94   :  { %135 = vrot.lane.b32.xlu1 %v128_v28, %s611_s23  ;;  %137 = vrot.lane.b32.xlu0 %v129_v29, %s611_s23 }
  0x98   :  { %161 = vrot.lane.b32.xlu1 %v155_v31, %s612_s24  ;;  %163 = vrot.lane.b32.xlu0 %v156_v32, %s612_s24 }
  0x9c   :  { %165 = vrot.lane.b32.xlu1 %v157_v34, %s612_s24  ;;  %189 = vrot.lane.b32.xlu0 %v183_v35, %s613_s25 }
  0xa0   :  { %191 = vrot.lane.b32.xlu1 %v184_v36, %s613_s25  ;;  %193 = vrot.lane.b32.xlu0 %v185_v37, %s613_s25 }
  0xa4   :  { %217 = vrot.lane.b32.xlu1 %v211_v39, %s614_s26  ;;  %219 = vrot.lane.b32.xlu0 %v212_v40, %s614_s26 }
  0xa8   :  { %221 = vrot.lane.b32.xlu1 %v213_v42, %s614_s26  ;;  %247 = vrot.lane.b32.xlu0 %v240_v43, %s615_s27 }
  0xac   :  { %245 = vrot.lane.b32.xlu1 %v239_v44, %s615_s27  ;;  %322 = vperm.xlu0 %605, %v586_v45  }
  0xb0   :  { %249 = vrot.lane.b32.xlu1 %v241_v46, %s615_s27  ;;  %349 = vperm.xlu0 %605, %v587_v47  }
  0xf2   :  { %v50_v50 = vpop.permute.xlu1 %49  ;;  %v52_v51 = vpop.permute.xlu0 %51 }
  0xf3   :  { %v56_v2 = vsel %vm55_vm0, %v50_v50, %v52_v51 }
  0xf4   :  { %v61_v7 = vadd.f32 %v56_v2, %v33_v3  ;;  %v589_v2 = vld [vmem:[%s896_s4 + $0x20] sm:$0xff]  ;;  %v588_v3 = vld [vmem:[%s896_s4 + $0x18] sm:$0xff] }
  0xf6   :  { %v54_v52 = vpop.permute.xlu1 %53  ;;  %v78_v53 = vpop.permute.xlu0 %77 }
  0xf7   :  { %v57_v8 = vsel %vm55_vm0, %v52_v51, %v54_v52  ;;  %v63_v14 = vadd.f32 %v54_v52, %v35_v6  ;;  %v592_v6 = vld [vmem:[%s896_s4 + $0x38] sm:$0xff] }
  0xf8   :  { %v62_v18 = vadd.f32 %v57_v8, %v34_v10  ;;  %v534_v8 = vld [vmem:[%s897_s5] sm:$0xff] }
  0xfa   :  { %v80_v54 = vpop.permute.xlu1 %79  ;;  %v82_v55 = vpop.permute.xlu0 %81 }
  0xfb   :  { %v84_v4 = vsel %vm83_vm1, %v78_v53, %v80_v54  ;;  %v85_v16 = vsel %vm83_vm1, %v80_v54, %v82_v55  ;;  %v91_v21 = vadd.f32 %v82_v55, %v63_v14  ;;  %v26_v14 = vld [vmem:[%s898_s1] sm:$0x7]  ;;  %s617_s1 = smov 73  }
  0xfc   :  { %v89_v17 = vadd.f32 %v84_v4, %v61_v7  ;;  %v90_v24 = vadd.f32 %v85_v16, %v62_v18  ;;  %v590_v4 = vld [vmem:[%s896_s4 + $0x28] sm:$0xff]  ;;  %v309_v7 = vld [vmem:[%s896_s4] sm:$0xff] }
  0xfe   :  { %v106_v56 = vpop.permute.xlu1 %105  ;;  %v108_v57 = vpop.permute.xlu0 %107 }
  0xff   :  { %v112_v13 = vsel %vm111_vm2, %v106_v56, %v108_v57 }
 0x100   :  { %v117_v22 = vadd.f32 %v112_v13, %v89_v17 }
 0x102   :  { %v110_v58 = vpop.permute.xlu1 %109  ;;  %v134_v59 = vpop.permute.xlu0 %133 }
 0x103   :  { %v113_v23 = vsel %vm111_vm2, %v108_v57, %v110_v58  ;;  %v119_v27 = vadd.f32 %v110_v58, %v91_v21 }
 0x104   :  { %v118_v30 = vadd.f32 %v113_v23, %v90_v24 }
 0x106   :  { %v136_v60 = vpop.permute.xlu1 %135  ;;  %v138_v61 = vpop.permute.xlu0 %137 }
 0x107   :  { %v140_v19 = vsel %vm139_vm3, %v134_v59, %v136_v60  ;;  %v141_v28 = vsel %vm139_vm3, %v136_v60, %v138_v61  ;;  %v147_v33 = vadd.f32 %v138_v61, %v119_v27 }
 0x108   :  { %v145_v29 = vadd.f32 %v140_v19, %v117_v22  ;;  %v146_v36 = vadd.f32 %v141_v28, %v118_v30 }
 0x10a   :  { %v162_v62 = vpop.permute.xlu1 %161  ;;  %v164_v63 = vpop.permute.xlu0 %163 }
 0x10b   :  { %v168_v25 = vsel %vm167_vm4, %v162_v62, %v164_v63 }
 0x10c   :  { %v173_v34 = vadd.f32 %v168_v25, %v145_v29 }
 0x10e   :  { %v166_v0 = vpop.permute.xlu1 %165  ;;  %v190_v1 = vpop.permute.xlu0 %189 }
 0x10f   :  { %v169_v35 = vsel %vm167_vm4, %v164_v63, %v166_v0  ;;  %v175_v38 = vadd.f32 %v166_v0, %v147_v33 }
 0x110   :  { %v174_v41 = vadd.f32 %v169_v35, %v146_v36 }
 0x112   :  { %v192_v5 = vpop.permute.xlu1 %191  ;;  %v194_v9 = vpop.permute.xlu0 %193 }
 0x113   :  { %v196_v31 = vsel %vm195_vm5, %v190_v1, %v192_v5  ;;  %v197_v39 = vsel %vm195_vm5, %v192_v5, %v194_v9  ;;  %v203_v44 = vadd.f32 %v194_v9, %v175_v38  ;;  %v593_v5 = vld [vmem:[%s896_s4 + $0x40] sm:$0xff]  ;;  %v276_v9 = vlaneseq }
 0x114   :  { %v201_v40 = vadd.f32 %v196_v31, %v173_v34  ;;  %v202_v48 = vadd.f32 %v197_v39, %v174_v41 }
 0x115   :  { %v277_v10 = vshrl.u32 %v276_v9, 7 }
 0x116   :  { %v218_v20 = vpop.permute.xlu1 %217  ;;  %v220_v26 = vpop.permute.xlu0 %219 }
 0x117   :  { %v224_v37 = vsel %vm223_vm6, %v218_v20, %v220_v26  ;;  %v286_v13 = vsub.s32 2, %v277_v10  ;;  %v282_v24 = vsub.s32 1, %v277_v10  ;;  %v278_v28 = vsub.s32 0, %v277_v10 }
 0x118   :  { %v229_v45 = vadd.f32 %v224_v37, %v201_v40 }
 0x119   :  { %v287_v17 = vrot.slane %v26_v14, %v286_v13  ;;  %v283_v27 = vrot.slane %v26_v14, %v282_v24  ;;  %v279_v35 = vrot.slane %v26_v14, %v278_v28 }
 0x11a   :  { %v222_v32 = vpop.permute.xlu1 %221  ;;  %v248_v42 = vpop.permute.xlu0 %247 }
 0x11b   :  { %v225_v46 = vsel %vm223_vm6, %v220_v26, %v222_v32  ;;  %v231_v50 = vadd.f32 %v222_v32, %v203_v44 }
 0x11c   :  { %v230_v52 = vadd.f32 %v225_v46, %v202_v48 }
 0x11e   :  { %v246_v43 = vpop.permute.xlu1 %245 }
 0x11f   :  { %v252_v47 = vsel %vm251_vm7, %v246_v43, %v248_v42 }
 0x120   :  { %v257_v51 = vadd.f32 %v252_v47, %v229_v45 }
 0x122   :  { %v250_v53 = vpop.permute.xlu1 %249  ;;  %v266_v57 = vadd.f32 %v752_v49, %v257_v51 }
 0x123   :  { %v253_v54 = vsel %vm251_vm7, %v248_v42, %v250_v53  ;;  %v259_v55 = vadd.f32 %v250_v53, %v231_v50 }
 0x124   :  { %v258_v56 = vadd.f32 %v253_v54, %v230_v52  ;;  %v269_v63 = vmax.f32 %v266_v57, 0.0 }
 0x125   :  { %v268_v58 = vadd.f32 %v752_v49, %v259_v55 }
 0x126   :  { %v267_v59 = vadd.f32 %v752_v49, %v258_v56  ;;  %v272_v1 = vmin.f32 %v269_v63, 6.0  ;;  %v591_v49 = vld [vmem:[%s896_s4 + $0x30] sm:$0xff] }
 0x127   :  { %v271_v60 = vmax.f32 %v268_v58, 0.0  ;;  %v323_v16 = vpop.permute.xlu0 %322 }
 0x128   :  { %v270_v61 = vmax.f32 %v267_v59, 0.0 }
 0x129   :  { %v274_v62 = vmin.f32 %v271_v60, 6.0 }
 0x12a   :  { %v273_v0 = vmin.f32 %v270_v61, 6.0 }
 0x12b   :  { %298 = vrot.lane.b32.xlu1 %v274_v62, %s616_s8  ;;  %v350_v20 = vpop.permute.xlu0 %349 }
 0x12c   :  { %296 = vrot.lane.b32.xlu0 %v273_v0, %s616_s8 }
 0x12f   :  { %294 = vrot.lane.b32.xlu1 %v272_v1, %s616_s8 }
 0x130   :  { %403 = vperm.xlu0 %605, %v589_v2  }
 0x133   :  { %376 = vperm.xlu1 %606, %v588_v3  }
 0x134   :  { %457 = vperm.xlu0 %605, %v591_v49  }
 0x137   :  { %430 = vperm.xlu1 %606, %v590_v4  }
 0x138   :  { %511 = vperm.xlu0 %605, %v593_v5  }
 0x13b   :  { %484 = vperm.xlu1 %606, %v592_v6  }
 0x13f   :  { %312 = vperm.xlu1 %606, %v309_v7  }
 0x143   :  { %537 = vperm.xlu1 %606, %v534_v8  }
 0x19d   :  { %v299_v18 = vpop.permute.xlu1 %298 }
 0x19e   :  { %v803_v19 = vmul.f32 %v299_v18, %v287_v17  ;;  %v297_v23 = vpop.permute.xlu0 %296 }
 0x19f   :  { %v302_v30 = vsel %vm300_vm8, %v297_v23, %v299_v18 }
 0x1a0   :  { %v327_v21 = vmul.f32 %v323_v16, %v803_v19  ;;  %v354_v22 = vmul.f32 %v350_v20, %v803_v19  ;;  %v812_v34 = vmul.f32 %v302_v30, %v283_v27 }
 0x1a1   :  { %v295_v25 = vpop.permute.xlu1 %294 }
 0x1a2   :  { %335 = vrot.lane.b32.xlu0 %v327_v21, %s608_s3  ;;  %362 = vrot.lane.b32.xlu1 %v354_v22, %s609_s22  ;;  %v301_v37 = vsel %vm300_vm8, %v295_v25, %v297_v23  ;;  %v326_v41 = vmul.f32 %v323_v16, %v812_v34  ;;  %v353_v47 = vmul.f32 %v350_v20, %v812_v34 }
 0x1a3   :  { %v818_v40 = vmul.f32 %v301_v37, %v279_v35 }
 0x1a5   :  { %v352_v44 = vmul.f32 %v350_v20, %v818_v40  ;;  %v325_v45 = vmul.f32 %v323_v16, %v818_v40 }
 0x1ab   :  { %v404_v26 = vpop.permute.xlu0 %403 }
 0x1ac   :  { %v408_v29 = vmul.f32 %v404_v26, %v803_v19  ;;  %v406_v48 = vmul.f32 %v404_v26, %v818_v40  ;;  %v407_v52 = vmul.f32 %v404_v26, %v812_v34 }
 0x1ae   :  { %416 = vrot.lane.b32.xlu1 %v408_v29, %s611_s23  ;;  %v377_v31 = vpop.permute.xlu1 %376 }
 0x1af   :  { %v381_v32 = vmul.f32 %v377_v31, %v803_v19  ;;  %v458_v33 = vpop.permute.xlu0 %457  ;;  %v380_v46 = vmul.f32 %v377_v31, %v812_v34  ;;  %v379_v50 = vmul.f32 %v377_v31, %v818_v40 }
 0x1b0   :  { %v462_v36 = vmul.f32 %v458_v33, %v803_v19  ;;  %v460_v53 = vmul.f32 %v458_v33, %v818_v40  ;;  %v461_v57 = vmul.f32 %v458_v33, %v812_v34 }
 0x1b1   :  { %389 = vrot.lane.b32.xlu0 %v381_v32, %s610_s0 }
 0x1b2   :  { %470 = vrot.lane.b32.xlu1 %v462_v36, %s613_s25  ;;  %v431_v38 = vpop.permute.xlu1 %430 }
 0x1b3   :  { %v435_v39 = vmul.f32 %v431_v38, %v803_v19  ;;  %v434_v51 = vmul.f32 %v431_v38, %v812_v34  ;;  %v433_v54 = vmul.f32 %v431_v38, %v818_v40  ;;  %v512_v56 = vpop.permute.xlu0 %511 }
 0x1b4   :  { %v515_v58 = vmul.f32 %v512_v56, %v812_v34  ;;  %v514_v60 = vmul.f32 %v512_v56, %v818_v40  ;;  %v516_v61 = vmul.f32 %v512_v56, %v803_v19 }
 0x1b5   :  { %443 = vrot.lane.b32.xlu0 %v435_v39, %s612_s24 }
 0x1b6   :  { %333 = vrot.lane.b32.xlu1 %v326_v41, %s608_s3  ;;  %v485_v42 = vpop.permute.xlu1 %484 }
 0x1b7   :  { %v489_v43 = vmul.f32 %v485_v42, %v803_v19  ;;  %v488_v55 = vmul.f32 %v485_v42, %v812_v34  ;;  %v487_v59 = vmul.f32 %v485_v42, %v818_v40 }
 0x1b9   :  { %497 = vrot.lane.b32.xlu0 %v489_v43, %s614_s26 }
 0x1ba   :  { %358 = vrot.lane.b32.xlu1 %v352_v44, %s609_s22  ;;  %v313_v62 = vpop.permute.xlu1 %312 }
 0x1bb   :  { %v317_v10 = vmul.f32 %v313_v62, %v803_v19  ;;  %v316_v17 = vmul.f32 %v313_v62, %v812_v34  ;;  %v315_v23 = vmul.f32 %v313_v62, %v818_v40 }
 0x1bd   :  { %331 = vrot.lane.b32.xlu0 %v325_v45, %s608_s3 }
 0x1be   :  { %387 = vrot.lane.b32.xlu1 %v380_v46, %s610_s0  ;;  %v860_v63 = vpop.permute.xlu1 %537 }
 0x1c1   :  { %360 = vrot.lane.b32.xlu0 %v353_v47, %s609_s22 }
 0x1c2   :  { %412 = vrot.lane.b32.xlu1 %v406_v48, %s611_s23 }
 0x1c5   :  { %385 = vrot.lane.b32.xlu0 %v379_v50, %s610_s0 }
 0x1c6   :  { %441 = vrot.lane.b32.xlu1 %v434_v51, %s612_s24 }
 0x1c9   :  { %414 = vrot.lane.b32.xlu0 %v407_v52, %s611_s23 }
 0x1ca   :  { %466 = vrot.lane.b32.xlu1 %v460_v53, %s613_s25 }
 0x1cd   :  { %439 = vrot.lane.b32.xlu0 %v433_v54, %s612_s24 }
 0x1ce   :  { %495 = vrot.lane.b32.xlu1 %v488_v55, %s614_s26 }
 0x1d1   :  { %468 = vrot.lane.b32.xlu0 %v461_v57, %s613_s25 }
 0x1d2   :  { %522 = vrot.lane.b32.xlu1 %v515_v58, %s615_s27 }
 0x1d5   :  { %493 = vrot.lane.b32.xlu0 %v487_v59, %s614_s26 }
 0x1d6   :  { %552 = vrot.lane.b32.xlu1 %v686_v11, %s617_s1 }
 0x1d9   :  { %520 = vrot.lane.b32.xlu0 %v514_v60, %s615_s27 }
 0x1da   :  { %556 = vrot.lane.b32.xlu1 %v697_v15, %s617_s1 }
 0x1dd   :  { %524 = vrot.lane.b32.xlu0 %v516_v61, %s615_s27 }
 0x1e1   :  { %554 = vrot.lane.b32.xlu0 %v691_v12, %s617_s1 }
 0x214   :  { %v363_v0 = vpop.permute.xlu1 %362  ;;  %v336_v1 = vpop.permute.xlu0 %335 }
 0x215   :  { %v344_v12 = vadd.f32 %v336_v1, %v317_v10 }
 0x217   :  { %v371_v20 = vadd.f32 %v363_v0, %v344_v12 }
 0x220   :  { %v417_v2 = vpop.permute.xlu1 %416 }
 0x223   :  { %v390_v3 = vpop.permute.xlu0 %389 }
 0x224   :  { %v471_v11 = vpop.permute.xlu1 %470  ;;  %v398_v26 = vadd.f32 %v390_v3, %v371_v20 }
 0x226   :  { %v425_v32 = vadd.f32 %v417_v2, %v398_v26 }
 0x227   :  { %v444_v49 = vpop.permute.xlu0 %443 }
 0x228   :  { %v334_v4 = vpop.permute.xlu1 %333  ;;  %v452_v43 = vadd.f32 %v444_v49, %v425_v32 }
 0x229   :  { %v338_v16 = vsel %vm55_vm0, %v334_v4, %v336_v1 }
 0x22a   :  { %v343_v24 = vadd.f32 %v338_v16, %v316_v17  ;;  %v479_v54 = vadd.f32 %v471_v11, %v452_v43 }
 0x22b   :  { %v498_v5 = vpop.permute.xlu0 %497 }
 0x22c   :  { %v359_v6 = vpop.permute.xlu1 %358  ;;  %v506_v61 = vadd.f32 %v498_v5, %v479_v54 }
 0x22f   :  { %v332_v7 = vpop.permute.xlu0 %331 }
 0x230   :  { %v388_v15 = vpop.permute.xlu1 %387  ;;  %v337_v21 = vsel %vm55_vm0, %v332_v7, %v334_v4 }
 0x231   :  { %v342_v27 = vadd.f32 %v337_v21, %v315_v23  ;;  %v392_v33 = vsel %vm111_vm2, %v388_v15, %v390_v3 }
 0x233   :  { %v361_v8 = vpop.permute.xlu0 %360 }
 0x234   :  { %v413_v9 = vpop.permute.xlu1 %412  ;;  %v365_v22 = vsel %vm83_vm1, %v361_v8, %v363_v0  ;;  %v364_v19 = vsel %vm83_vm1, %v359_v6, %v361_v8 }
 0x235   :  { %v370_v28 = vadd.f32 %v365_v22, %v343_v24  ;;  %v369_v31 = vadd.f32 %v364_v19, %v342_v27 }
 0x237   :  { %v386_v13 = vpop.permute.xlu0 %385  ;;  %v397_v37 = vadd.f32 %v392_v33, %v370_v28 }
 0x238   :  { %v442_v14 = vpop.permute.xlu1 %441  ;;  %v391_v30 = vsel %vm111_vm2, %v386_v13, %v388_v15 }
 0x239   :  { %v396_v36 = vadd.f32 %v391_v30, %v369_v31  ;;  %v446_v47 = vsel %vm167_vm4, %v442_v14, %v444_v49 }
 0x23b   :  { %v415_v18 = vpop.permute.xlu0 %414 }
 0x23c   :  { %v467_v25 = vpop.permute.xlu1 %466  ;;  %v418_v34 = vsel %vm139_vm3, %v413_v9, %v415_v18  ;;  %v419_v35 = vsel %vm139_vm3, %v415_v18, %v417_v2 }
 0x23d   :  { %v423_v41 = vadd.f32 %v418_v34, %v396_v36  ;;  %v424_v42 = vadd.f32 %v419_v35, %v397_v37 }
 0x23f   :  { %v440_v29 = vpop.permute.xlu0 %439  ;;  %v451_v51 = vadd.f32 %v446_v47, %v424_v42 }
 0x240   :  { %v496_v38 = vpop.permute.xlu1 %495  ;;  %v445_v40 = vsel %vm167_vm4, %v440_v29, %v442_v14 }
 0x241   :  { %v450_v45 = vadd.f32 %v445_v40, %v423_v41  ;;  %v500_v62 = vsel %vm223_vm6, %v496_v38, %v498_v5 }
 0x243   :  { %v469_v39 = vpop.permute.xlu0 %468 }
 0x244   :  { %v472_v44 = vsel %vm195_vm5, %v467_v25, %v469_v39  ;;  %v473_v48 = vsel %vm195_vm5, %v469_v39, %v471_v11  ;;  %v523_v53 = vpop.permute.xlu1 %522 }
 0x245   :  { %v477_v52 = vadd.f32 %v472_v44, %v450_v45  ;;  %v478_v55 = vadd.f32 %v473_v48, %v451_v51 }
 0x247   :  { %v494_v46 = vpop.permute.xlu0 %493  ;;  %v505_v2 = vadd.f32 %v500_v62, %v478_v55 }
 0x248   :  { %v499_v50 = vsel %vm223_vm6, %v494_v46, %v496_v38  ;;  %v553_v60 = vpop.permute.xlu1 %552 }
 0x249   :  { %v504_v56 = vadd.f32 %v499_v50, %v477_v52 }
 0x24b   :  { %v521_v57 = vpop.permute.xlu0 %520 }
 0x24c   :  { %v526_v58 = vsel %vm251_vm7, %v521_v57, %v523_v53  ;;  %v557_v9 = vpop.permute.xlu1 %556 }
 0x24d   :  { %v531_v59 = vadd.f32 %v526_v58, %v504_v56 }
 0x24f   :  { %v540_v0 = vadd.f32 %v860_v63, %v531_v59  ;;  %v525_v1 = vpop.permute.xlu0 %524 }
 0x250   :  { %v527_v3 = vsel %vm251_vm7, %v523_v53, %v525_v1  ;;  %v533_v49 = vadd.f32 %v525_v1, %v506_v61 }
 0x251   :  { %v532_v4 = vadd.f32 %v527_v3, %v505_v2  ;;  %v543_v6 = vmax.f32 %v540_v0, 0.0 }
 0x252   :  { %v542_v11 = vadd.f32 %v860_v63, %v533_v49 }
 0x253   :  { %v541_v7 = vadd.f32 %v860_v63, %v532_v4  ;;  %v555_v15 = vpop.permute.xlu0 %554  ;;  %v546_v8 = vmin.f32 %v543_v6, 6.0 }
 0x254   :  { %v559_v10 = vsel %vm558_vm9, %v553_v60, %v555_v15  ;;  %v545_v13 = vmax.f32 %v542_v11, 0.0  ;;  %v560_v16 = vsel %vm558_vm9, %v555_v15, %v557_v9 }
 0x255   :  { %v564_v5 = vadd.f32 %v559_v10, %v546_v8  ;;  %v544_v12 = vmax.f32 %v541_v7, 0.0 }
 0x256   :  { %v548_v14 = vmin.f32 %v545_v13, 6.0 }
 0x257   :  { %v567_v17 = vmax.f32 %v564_v5, 0.0  ;;  %v547_v18 = vmin.f32 %v544_v12, 6.0 }
 0x258   :  { %v566_v20 = vadd.f32 %v557_v9, %v548_v14 }
 0x259   :  { %570 = vst [vmem:[%s899_s6] sm:$0xff] %v567_v17  ;;  %v565_v21 = vadd.f32 %v560_v16, %v547_v18 }
 0x25a   :  { %v569_v22 = vmax.f32 %v566_v20, 0.0 }
 0x25b   :  { %v568_v63 = vmax.f32 %v565_v21, 0.0 }
 0x25c   :  { %573 = vst.msk [vmem:[%s899_s6 + $0x10] sm:$0xff] %vm572_vm10, %v569_v22 }
 0x25d   :  { %571 = vst [vmem:[%s899_s6 + $0x8] sm:$0xff] %v568_v63 }

</bundles_post_ra>
